<compile_context>
chip_gen: v7x
topology: tpu7x:2x2x1
jax: 0.10.0
libtpu: 0.0.40
codegen_flags: <defaults>
</compile_context>

<pallas_src>
import jax
import jax.numpy as jnp
from jax.experimental import pallas as pl
from jax.experimental.pallas import tpu as pltpu


def _make_attention_kernel(C, use_vpu):
    def kernel(w_ref, b_ref, x_ref, o_ref):
        # x_ref/o_ref: (C, TN)  (batch dim squeezed by BlockSpec)
        # b_ref: SMEM (1,) f32 scalar bias
        # w_ref: SMEM (C,) f32 (VPU path)  or  VMEM (1, C) x.dtype (MXU path)
        x = x_ref[...]                                            # (C, TN)
        if use_vpu:
            # Unrolled VPU reduction over the small, static channel dim:
            # a handful of scalar*vector FMAs beats a 1-row MXU matmul.
            att = w_ref[0] * x[0:1, :].astype(jnp.float32)        # (1, TN)
            for c in range(1, C):                                 # static unroll
                att = att + w_ref[c] * x[c:c + 1, :].astype(jnp.float32)
            att = att + b_ref[0]
        else:
            # MXU path for large C: matched dtypes, f32 accumulation.
            att = jnp.dot(w_ref[...], x,
                          preferred_element_type=jnp.float32) + b_ref[0]  # (1, TN)
        gate = jax.nn.sigmoid(att)                                # (1, TN), EUP
        o_ref[...] = (x * gate).astype(o_ref.dtype)               # broadcast over C
    return kernel


def _plan_tiling(N, C, itemsize, *, max_tile=2048,
                 hbm_gbps=1200.0, step_overhead_us=0.35,
                 vmem_budget_bytes=24 * 1024 * 1024):
    """Pick (TN, N_pad): lane-dense tile (multiple of 128) + padded spatial extent.

    Cost model (per batch, in 'spatial columns'):
        cost(t) = n_pad(t) + n_steps(t) * overhead_cols
    where overhead_cols = columns of read+write traffic that fit in one
    per-grid-step overhead.  TN is additionally capped so the double-buffered
    input + output tiles fit in the VMEM budget.
    """
    # VMEM cap: 2 buffers each for the input and output (C, TN) tiles.
    max_cols = vmem_budget_bytes // max(1, 4 * C * itemsize)
    vmem_cap = max(128, (max_cols // 128) * 128)
    max_tile = max(128, min(max_tile, vmem_cap))

    bytes_per_col = 2.0 * C * itemsize            # read + write of one column
    overhead_cols = (step_overhead_us * 1e-6) * (hbm_gbps * 1e9) / bytes_per_col

    best = None
    t = 128
    while t <= max_tile:
        n_pad = pl.cdiv(N, t) * t
        steps = n_pad // t
        cost = n_pad + steps * overhead_cols
        if best is None or cost < best[0]:
            best = (cost, t, n_pad)
        t += 128
    _, tn, n_pad = best
    return tn, n_pad


def attention_block(x_nchw, weight, bias):
    """x_nchw: (B, C, H, W); weight: (1, C, 1, 1); bias: (1,) -- nn.Conv2d(C, 1, 1)."""
    B, C, H, W = x_nchw.shape
    N = H * W
    x = x_nchw.reshape(B, C, N)
    itemsize = jnp.dtype(x.dtype).itemsize

    TN, N_pad = _plan_tiling(N, C, itemsize)
    if N_pad != N:
        # Pad the spatial axis so every tile is lane-dense (unmasked full-width
        # stores); padding columns are sliced off afterwards.
        x = jnp.pad(x, ((0, 0), (0, 0), (0, N_pad - N)))
    grid = (B, N_pad // TN)

    use_vpu = C <= 32
    if use_vpu:
        w_arr = weight.reshape(C).astype(jnp.float32)
        w_spec = pl.BlockSpec(memory_space=pltpu.MemorySpace.SMEM)
    else:
        # MXU path: match the activation dtype (e.g. bf16) for the fast MXU path.
        w_arr = weight.reshape(1, C).astype(x.dtype)
        w_spec = pl.BlockSpec((1, C), lambda b, n: (0, 0))
    b_arr = bias.reshape(1).astype(jnp.float32)
    b_spec = pl.BlockSpec(memory_space=pltpu.MemorySpace.SMEM)

    x_spec = pl.BlockSpec((pl.Squeezed(), C, TN), lambda b, n: (b, 0, n))
    o_spec = pl.BlockSpec((pl.Squeezed(), C, TN), lambda b, n: (b, 0, n))

    cost = pl.CostEstimate(
        flops=int(3 * B * C * N),             # channel reduction + gate multiply
        transcendentals=int(B * N),           # sigmoid per spatial location
        bytes_accessed=int(2 * B * C * N * itemsize),
    )

    out = pl.pallas_call(
        _make_attention_kernel(C, use_vpu),
        out_shape=jax.ShapeDtypeStruct((B, C, N_pad), x.dtype),
        grid_spec=pltpu.PrefetchScalarGridSpec(
            num_scalar_prefetch=0,
            grid=grid,
            in_specs=[w_spec, b_spec, x_spec],
            out_specs=o_spec,
        ),
        compiler_params=pltpu.CompilerParams(
            dimension_semantics=("parallel", "parallel"),
            vmem_limit_bytes=32 * 1024 * 1024,
        ),
        cost_estimate=cost,
    )(w_arr, b_arr, x)

    if N_pad != N:
        out = out[:, :, :N]
    return out.reshape(B, C, H, W)


def _reference(x_nchw, weight, bias):
    # Pure-JAX reference of the PyTorch forward (1x1 conv -> sigmoid -> gate).
    att = jnp.einsum("bchw,oc->bohw", x_nchw, weight.reshape(1, -1)) + bias.reshape(1, 1, 1, 1)
    return x_nchw * jax.nn.sigmoid(att)


if __name__ == "__main__":
    key = jax.random.PRNGKey(0)
    k_x, k_w, k_b = jax.random.split(key, 3)

    B, C, H, W = 2, 4, 16, 16
    x = jax.random.normal(k_x, (B, C, H, W), dtype=jnp.float32)

    # Deterministic params matching nn.Conv2d(in_channels=C, out_channels=1, k=1).
    weight = jax.random.normal(k_w, (1, C, 1, 1), dtype=jnp.float32) * 0.1
    bias = jax.random.normal(k_b, (1,), dtype=jnp.float32) * 0.1

    out = attention_block(x, weight, bias)
    jax.block_until_ready(out)

    ref = _reference(x, weight, bias)
    assert out.shape == (B, C, H, W)
    assert jnp.allclose(out, ref, atol=1e-5, rtol=1e-5), "mismatch vs reference"

    print("KERNEL_OK")
</pallas_src>

<mosaic_0001>
module attributes {stable_mosaic.version = 11 : i64} {
  func.func @kernel(%arg0: i32, %arg1: i32, %arg2: memref<4xf32, #tpu.memory_space<smem>>, %arg3: memref<1xf32, #tpu.memory_space<smem>>, %arg4: memref<1x4x256xf32, #tpu.memory_space<vmem>>, %arg5: memref<1x4x256xf32, #tpu.memory_space<vmem>>) attributes {dimension_semantics = [#tpu.dimension_semantics<parallel>, #tpu.dimension_semantics<parallel>], iteration_bounds = array<i64: 2, 1>, scalar_prefetch = 0 : i64, scratch_operands = 0 : i64, tpu.core_type = #tpu.core_type<tc>, window_params = [{transform_indices = @transform_0, window_bounds = array<i64: 4>}, {transform_indices = @transform_1, window_bounds = array<i64: 1>}, {transform_indices = @transform_2, window_bounds = array<i64: 1, 4, 256>}, {transform_indices = @transform_3, window_bounds = array<i64: 1, 4, 256>}]} {
    %c0 = arith.constant 0 : index
    %c0_0 = arith.constant 0 : index
    %c0_1 = arith.constant 0 : index
    %0 = vector.load %arg4[%c0, %c0_0, %c0_1] : memref<1x4x256xf32, #tpu.memory_space<vmem>>, vector<1x4x256xf32>
    %1 = vector.shape_cast %0 : vector<1x4x256xf32> to vector<4x256xf32>
    %c0_2 = arith.constant 0 : index
    %2 = memref.load %arg2[%c0_2] : memref<4xf32, #tpu.memory_space<smem>>
    %3 = vector.extract_strided_slice %1 {offsets = [0, 0], sizes = [1, 256], strides = [1, 1]} : vector<4x256xf32> to vector<1x256xf32>
    %4 = vector.broadcast %2 : f32 to vector<1x256xf32>
    %5 = arith.mulf %4, %3 : vector<1x256xf32>
    %c1 = arith.constant 1 : index
    %6 = memref.load %arg2[%c1] : memref<4xf32, #tpu.memory_space<smem>>
    %7 = vector.extract_strided_slice %1 {offsets = [1, 0], sizes = [1, 256], strides = [1, 1]} : vector<4x256xf32> to vector<1x256xf32>
    %8 = vector.broadcast %6 : f32 to vector<1x256xf32>
    %9 = arith.mulf %8, %7 : vector<1x256xf32>
    %10 = arith.addf %5, %9 : vector<1x256xf32>
    %c2 = arith.constant 2 : index
    %11 = memref.load %arg2[%c2] : memref<4xf32, #tpu.memory_space<smem>>
    %12 = vector.extract_strided_slice %1 {offsets = [2, 0], sizes = [1, 256], strides = [1, 1]} : vector<4x256xf32> to vector<1x256xf32>
    %13 = vector.broadcast %11 : f32 to vector<1x256xf32>
    %14 = arith.mulf %13, %12 : vector<1x256xf32>
    %15 = arith.addf %10, %14 : vector<1x256xf32>
    %c3 = arith.constant 3 : index
    %16 = memref.load %arg2[%c3] : memref<4xf32, #tpu.memory_space<smem>>
    %17 = vector.extract_strided_slice %1 {offsets = [3, 0], sizes = [1, 256], strides = [1, 1]} : vector<4x256xf32> to vector<1x256xf32>
    %18 = vector.broadcast %16 : f32 to vector<1x256xf32>
    %19 = arith.mulf %18, %17 : vector<1x256xf32>
    %20 = arith.addf %15, %19 : vector<1x256xf32>
    %c0_3 = arith.constant 0 : index
    %21 = memref.load %arg3[%c0_3] : memref<1xf32, #tpu.memory_space<smem>>
    %22 = vector.broadcast %21 : f32 to vector<1x256xf32>
    %23 = arith.addf %20, %22 : vector<1x256xf32>
    %24 = arith.negf %23 : vector<1x256xf32>
    %25 = math.exp %24 : vector<1x256xf32>
    %cst = arith.constant 1.000000e+00 : f32
    %26 = vector.broadcast %cst : f32 to vector<1x256xf32>
    %27 = arith.addf %26, %25 : vector<1x256xf32>
    %28 = arith.divf %26, %27 : vector<1x256xf32>
    %29 = vector.broadcast %28 : vector<1x256xf32> to vector<4x256xf32>
    %30 = arith.mulf %1, %29 : vector<4x256xf32>
    %c0_4 = arith.constant 0 : index
    %c0_5 = arith.constant 0 : index
    %c0_6 = arith.constant 0 : index
    %31 = vector.load %arg5[%c0_4, %c0_5, %c0_6] : memref<1x4x256xf32, #tpu.memory_space<vmem>>, vector<1x4x256xf32>
    %32 = vector.shape_cast %31 : vector<1x4x256xf32> to vector<4x256xf32>
    %33 = vector.shape_cast %30 : vector<4x256xf32> to vector<1x4x256xf32>
    tpu.vector_store %arg5[%c0_4, %c0_5, %c0_6], %33 {strides = array<i32>} : memref<1x4x256xf32, #tpu.memory_space<vmem>>, vector<1x4x256xf32>,
    return
  }
  func.func @transform_0(%arg0: i32, %arg1: i32) -> i32 {
    %c0_i32 = arith.constant 0 : i32
    %c0_i32_0 = arith.constant 0 : i32
    return %c0_i32 : i32
  }
  func.func @transform_1(%arg0: i32, %arg1: i32) -> i32 {
    %c0_i32 = arith.constant 0 : i32
    %c0_i32_0 = arith.constant 0 : i32
    return %c0_i32 : i32
  }
  func.func @transform_2(%arg0: i32, %arg1: i32) -> (i32, i32, i32) {
    %c0_i32 = arith.constant 0 : i32
    %c0_i32_0 = arith.constant 0 : i32
    return %arg0, %c0_i32, %arg1 : i32, i32, i32
  }
  func.func @transform_3(%arg0: i32, %arg1: i32) -> (i32, i32, i32) {
    %c0_i32 = arith.constant 0 : i32
    %c0_i32_0 = arith.constant 0 : i32
    return %arg0, %c0_i32, %arg1 : i32, i32, i32
  }
}

</mosaic_0001>

<bundles_post_ra>
// kernel: tpu_custom_call.1
= control target key start
LH: loop header
LB: loop body
LE: loop exit
PB: predicated region body
PF: predicated region fallthrough
CT: control target
= control target key end

     0   :  { %s862_s0 = inlined_call_operand.vmem [shape: f32[4], index: 0, kind: input, shape index: {}]   ;;  %s863_s1 = inlined_call_operand.<no memory space> [shape: f32[1], index: 1, kind: input, shape index: {}]   ;;  %s864_s2 = inlined_call_operand.hbm [shape: f32[2,4,256], index: 2, kind: input, shape index: {}]   ;;  %s865_s3 = inlined_call_operand.hbm [shape: f32[2,4,256], index: 3, kind: output, shape index: {}]  }
   0x1   :  { %8 = sst [smem:[#allocation2]] %s863_s1 }
   0x2   :  { %9 = vsyncpa [#allocation6], 0 }
   0x3   :  { %10 = vsyncpa [#allocation4], 0 }
   0x4   :  { %12 = vsyncpa [#allocation4 + $0x1], 0 }
   0x5   :  { %13 = vsyncpa [#allocation5], 0 }
   0x6   :  { %15 = vsyncpa [#allocation5 + $0x1], 0  ;;  %s659_s14 = smov 0   ;;  %s661_s15 = smov 0  }
   0x7   :  { %s663_s16 = smov 0   ;;  %s665_s17 = smov 0  }
   0x8   :  { %s667_s18 = smov 0   ;;  %s669_s19 = smov 0  }
   0x9 LB: > { %s397_s1 = sadd.s32 4294967295, %s631_s19   ;;  %s398_s20 = sadd.s32 4294967294, %s631_s19   ;;  %s631_s19 = sphi %s669_s19, %s21_s19   ;;  %s627_s18 = sphi %s667_s18, %s887_s18   ;;  %s623_s17 = sphi %s665_s17, %s886_s17   ;;  %s619_s16 = sphi %s663_s16, %s885_s16   ;;  %s615_s15 = sphi %s661_s15, %s884_s15   ;;  %s611_s14 = sphi %s659_s14, %s883_s14  }
   0xa   : > { %p97_p0 = scmp.ne.s32.totalorder %s615_s15, %s611_s14  ;;  %p693_p1 = scmp.eq.s32.totalorder %s397_s1, 0 }
   0xb   : > { %p697_p2 = scmp.eq.s32.totalorder %s397_s1, 1  ;;  %p129_p3 = scmp.eq.s32.totalorder %s398_s20, 1 }
   0xc   : > { %s870_s21 = scalar_select %p693_p1, 1, 0 }
   0xd   : > { %p703_p4 = por %p693_p1, %p97_p0  ;;  %p399_p5 = scmp.ge.s32.totalorder %s631_s19, 1 }
   0xe   : > { %p708_p6 = por %p129_p3, %p97_p0  ;;  %p136_p7 = scmp.lt.s32.totalorder %s631_s19, 3 }
   0xf   : > { %s872_s23 = scalar_select %p703_p4, 1, 0 }
  0x10   : > { %s873_s24 = scalar_select %p708_p6, 1, 0 }
  0x11   : > { %s149_s27 = sshll.u32 %s862_s0, 4  ;;  %p716_p8 = pnand %p399_p5, %p136_p7  ;;  %s150_s27 = int_to_ptr.vmem [resolvable:$true] %s149_s27 }
  0x12   : > { %s33_s30 = sadd.s32 1, %s627_s18  ;;  %s84_s4 = sadd.s32 1, %s619_s16 }
  0x13   : > { %p431_p10 = pneg %p716_p8  ;;  %p35_p12 = scmp.ge.s32.totalorder %s33_s30, 2 }
  0x14   : > { %s500_s5 = scalar_lea.vmem %s150_s27, 16  ;;  %p508_p7 = scmp.lt.s32.totalorder %s150_s27, %s150_s27 }
  0x15   : > { %p725_p11 = pnand %p431_p10, %p693_p1  ;;  %p501_p13 = scmp.ne.s32.totalorder %s150_s27, %s500_s5 }
  0x16   : > { %p509_p6 = scmp.lt.s32.totalorder %s500_s5, %s500_s5 }
  0x17   : > { %p502_p0 = pneg %p725_p11 }
  0x18   : > { %p510_p9 = por %p509_p6, %p508_p7 }
  0x19   : > { %p503_p3 = pnand %p502_p0, %p501_p13 }
  0x1b   : > { %p504_p5 = pneg %p503_p3 }
  0x1d   : > { %p511_p4 = pnand %p510_p9, %p504_p5 }
  0x1f   : > { %514 = shalt.err (!%p511_p4)
}
  0x20   : > { %s633_s6 = smov [#allocation3]   ;;  %s889_s30 = smov (%p35_p12, %s33_s30), 0 }
  0x21   : > { %434 = dma.vmem_to_smem (!%p725_p11), %s150_s27, 16, %s633_s6, [#allocation6]  }
  0x22   : > { %p91_p10 = scmp.ne.s32.totalorder %s619_s16, %s615_s15  ;;  %p92_p6 = scmp.eq.s32.totalorder %s631_s19, 0 }
  0x23   : > { %s79_s7 = ssub.s32 %s627_s18, %s889_s30  ;;  %p444_p4 = scmp.lt.s32.totalorder %s631_s19, 2 }
  0x24   : > { %p82_p9 = scmp.eq.s32.totalorder %s79_s7, 0  ;;  %p93_p13 = por %p92_p6, %p91_p10 }
  0x25   : > { %p745_p0 = por %p697_p2, %p91_p10  ;;  %s163_s9 = sand.u32 1, %s619_s16  }
  0x26   : > { %s751_s10 = scalar_select %p82_p9, %s619_s16, %s84_s4  }
  0x27   : > { %s876_s8 = scalar_select %p745_p0, 1, 0 }
  0x28   : > { %s402_s11 = sshll.u32 %s163_s9, 3  ;;  %s421_s12 = sshll.u32 %s627_s18, 7 }
  0x29   : > { %s757_s20 = scalar_lea.hbm %s864_s2, %s421_s12  ;;  %s167_s25 = scalar_lea.vmem [#allocation7], %s402_s11 }
  0x2a   : > { %s177_s22 = sshll.u32 %s167_s25, 4  ;;  %p761_p2 = pnand %p444_p4, %p93_p13  ;;  %s759_s22 = int_to_ptr.vmem [resolvable:$true] %s177_s22 }
  0x2b   : > { %s164_s27 = scalar_lea.sflag [#allocation4], %s163_s9  ;;  %s515_s29 = scalar_lea.hbm %s757_s20, 128 }
  0x2c   : > { %p516_p11 = scmp.ne.s32.totalorder %s757_s20, %s515_s29  ;;  %p517_p12 = pneg %p761_p2 }
  0x2d   : > { %s520_s6 = scalar_lea.hbm %s864_s2, 256  ;;  %p521_p7 = scmp.lt.u32.totalorder %s757_s20, %s864_s2 }
  0x2e   : > { %p518_p3 = pnand %p517_p12, %p516_p11  ;;  %p522_p10 = scmp.lt.u32.totalorder %s520_s6, %s515_s29 }
  0x2f   : > { %p524_p4 = scmp.lt.u32.totalorder %s515_s29, %s757_s20 }
  0x30   : > { %p519_p5 = pneg %p518_p3  ;;  %p523_p6 = por %p522_p10, %p521_p7 }
  0x32   : > { %p525_p9 = por %p524_p4, %p523_p6 }
  0x34   : > { %p526_p13 = pnand %p525_p9, %p519_p5 }
  0x36   : > { %529 = shalt.err (!%p526_p13)
}
  0x37   : > { %s530_s9 = scalar_lea.vmem %s759_s22, 128  ;;  %s634_s12 = smov [#allocation7]  }
  0x38   : > { %p531_p11 = scmp.ne.s32.totalorder %s759_s22, %s530_s9  ;;  %s535_s13 = sshll.u32 %s634_s12, 4  ;;  %s536_s13 = int_to_ptr.vmem [resolvable:$false] %s535_s13 }
  0x39   : > { %s537_s1 = scalar_lea.vmem %s536_s13, 256  ;;  %p538_p1 = scmp.lt.s32.totalorder %s759_s22, %s536_s13 }
  0x3a   : > { %p533_p3 = pnand %p531_p11, %p517_p12  ;;  %p539_p7 = scmp.lt.s32.totalorder %s537_s1, %s530_s9 }
  0x3c   : > { %p534_p0 = pneg %p533_p3  ;;  %p540_p10 = por %p539_p7, %p538_p1 }
  0x3e   : > { %p541_p6 = pnand %p540_p10, %p534_p0 }
  0x40   : > { %544 = shalt.err (!%p541_p6)
}
  0x41   : > { %438 = dma.hbm_to_vmem [thread:$0]  (!%p761_p2), %s757_s20, 128, %s759_s22, %s164_s27  }
  0x42   : > { %186 = sbr.rel (%p716_p8) target bundleno = 147 (0x93), region = 32  ;;  %p878_p12 = scmp.ne.s32.totalorder (!%p716_p8), %s870_s21, 0 }
  0x49   : > { %598 = dma.done.wait (%p878_p12), [#allocation6], 16  }
  0x4a   : > { %600 = vsyncadd (%p878_p12), [#allocation6], 4294967280  ;;  %s797_s25 = sand.u32 1, %s615_s15   ;;  %p879_p1 = scmp.ne.s32.totalorder %s872_s23, 0 }
  0x4b   : > { %s407_s26 = sshll.u32 %s797_s25, 3  ;;  %s193_s29 = scalar_lea.sflag [#allocation4], %s797_s25 }
  0x4c   : > { %s196_s20 = scalar_lea.vmem [#allocation7], %s407_s26 }
  0x4d   : > { %602 = dma.done.wait (%p879_p1), %s193_s29, 128  }
  0x4e   : > { %604 = vsyncadd (%p879_p1), %s193_s29, 4294967168 }
  0x4f   : > { %201 = sfence }
  0x50   : > { %s223_s28 = sld [smem:[#allocation3]]  ;;  %s409_s21 = sld [smem:[#allocation3 + $0x1]]  ;;  %v222_v0 = vld [vmem:[%s196_s20] sm:$0xff]  ;;  %v260_v20 = vlaneseq }
  0x51   : > { %s411_s22 = sld [smem:[#allocation3 + $0x2]]  ;;  %s413_s27 = sld [smem:[#allocation3 + $0x3]] }
  0x52   : > { %s250_s4 = sld [smem:[#allocation2]]  ;;  %v261_v21 = vshrl.u32 %v260_v20, 7  ;;  %s219_s23 = scalar_lea.vmem [#allocation8], %s407_s26 }
  0x53   : > { %s301_s5 = sshll.u32 %s219_s23, 4  ;;  %s422_s6 = sshll.u32 %s623_s17, 7  ;;  %s810_s5 = int_to_ptr.vmem [resolvable:$true] %s301_s5 }
  0x54   : > { %v262_v22 = vsub.s32 0, %v261_v21  ;;  %v266_v23 = vsub.s32 4, %v261_v21  ;;  %s815_s9 = scalar_lea.hbm %s865_s3, %s422_s6  ;;  %s285_s12 = scalar_lea.sflag [#allocation5], %s797_s25 }
  0x55   : > { %s545_s13 = scalar_lea.vmem %s810_s5, 128  ;;  %p880_p0 = scmp.ne.s32.totalorder %s876_s8, 0 }
  0x56   : > { %v224_v1 = vstv %s223_s28  ;;  %v227_v2 = vstv %s409_s21  ;;  %p546_p8 = scmp.ne.s32.totalorder %s810_s5, %s545_s13  ;;  %s635_s17 = smov [#allocation8]  }
  0x57   : > { %v235_v3 = vstv %s411_s22  ;;  %v225_v4 = vmul.f32 %v224_v1, %v222_v0  ;;  %v228_v5 = vmul.f32 %v227_v2, %v222_v0  ;;  %v243_v7 = vstv %s413_s27  ;;  %s549_s1 = sshll.u32 %s635_s17, 4  ;;  %s550_s1 = int_to_ptr.vmem [resolvable:$false] %s549_s1 }
  0x58   : > { %v236_v6 = vmul.f32 %v235_v3, %v222_v0  ;;  %v244_v8 = vmul.f32 %v243_v7, %v222_v0  ;;  %v251_v14 = vstv %s250_s4  ;;  %p547_p2 = pnand %p546_p8, %p880_p0  ;;  %s551_s26 = scalar_lea.vmem %s550_s1, 256 }
  0x59   : > { %v410_v9 = vrot.slane %v228_v5, 9  ;;  %p552_p4 = scmp.lt.s32.totalorder %s810_s5, %s550_s1  ;;  %p553_p9 = scmp.lt.s32.totalorder %s551_s26, %s545_s13 }
  0x5a   : > { %v412_v10 = vrot.slane %v236_v6, 10  ;;  %v414_v12 = vrot.slane %v244_v8, 11  ;;  %p548_p5 = pneg %p547_p2 }
  0x5b   : > { %v233_v11 = vadd.f32 %v410_v9, %v225_v4  ;;  %p554_p13 = por %p553_p9, %p552_p4 }
  0x5d   : > { %v241_v13 = vadd.f32 %v412_v10, %v233_v11  ;;  %p555_p11 = pnand %p554_p13, %p548_p5 }
  0x5f   : > { %v249_v15 = vadd.f32 %v414_v12, %v241_v13 }
  0x61   : > { %v252_v16 = vadd.f32 %v251_v14, %v249_v15 }
  0x63   : > { %v415_v17 = vmul.f32 -1.442695, %v252_v16 }
  0x65   : > { %496 = vpow2.f32 %v415_v17 }
  0x6f   : > { %v497_v18 = vpop.eup %496 }
  0x70   : > { %v256_v19 = vadd.f32 1.0, %v497_v18 }
  0x72   : > { %498 = vrcp.f32 %v256_v19 }
  0x7c   : > { %v499_v24 = vpop.eup %498 }
  0x7d   : > { %v263_v25 = vrot.slane %v499_v24, %v262_v22  ;;  %v267_v26 = vrot.slane %v499_v24, %v266_v23 }
  0x7f   : > { %v273_v27 = vrot.slane %v263_v25, %v262_v22  ;;  %v277_v28 = vrot.slane %v267_v26, %v262_v22 }
  0x81   : > { %v280_v29 = vcombine.low %v273_v27, %v277_v28 }
  0x83   : > { %v282_v30 = vmul.f32 %v280_v29, %v222_v0 }
  0x85   : > { %283 = vst [vmem:[%s219_s23] sm:$0xff] %v282_v30 }
  0x86   : > { %558 = shalt.err (!%p555_p11)
}
  0x87   : > { %s559_s25 = scalar_lea.hbm %s815_s9, 128  ;;  %s563_s28 = scalar_lea.hbm %s865_s3, 256 }
  0x88   : > { %p560_p3 = scmp.ne.s32.totalorder %s815_s9, %s559_s25  ;;  %p564_p6 = scmp.lt.u32.totalorder %s815_s9, %s865_s3 }
  0x89   : > { %p565_p12 = scmp.lt.u32.totalorder %s563_s28, %s559_s25  ;;  %p567_p8 = scmp.lt.u32.totalorder %s559_s25, %s815_s9 }
  0x8a   : > { %p561_p7 = pnand %p560_p3, %p880_p0 }
  0x8b   : > { %p566_p1 = por %p565_p12, %p564_p6 }
  0x8c   : > { %p562_p10 = pneg %p561_p7 }
  0x8d   : > { %p568_p2 = por %p567_p8, %p566_p1 }
  0x8f   : > { %p569_p5 = pnand %p568_p2, %p562_p10 }
  0x91   : > { %572 = shalt.err (!%p569_p5)
}
  0x92   : > { %429 = dma.vmem_to_hbm [thread:$0]  (%p880_p0), %s810_s5, 128, %s815_s9, %s285_s12  }
  0x93 PF: > { %s313_s27 = sand.u32 1, %s611_s14   ;;  %p881_p4 = scmp.ne.s32.totalorder %s873_s24, 0 }
  0x94   : > { %p882_p9 = scmp.ge.s32.totalorder %s631_s19, 2  ;;  %s314_s4 = scalar_lea.sflag [#allocation5], %s313_s27 }
  0x96   : > { %p440_p13 = pnand %p882_p9, %p881_p4 }
  0x98   : > { %606 = dma.done.wait (!%p440_p13), %s314_s4, 128  }
  0x99   : > { %608 = vsyncadd (!%p440_p13), %s314_s4, 4294967168  ;;  %s21_s19 = sadd.s32 1, %s631_s19   ;;  %s883_s14 = smov %s615_s15 }
  0x9a   : > { %p18_p11 = scmp.ge.s32.totalorder %s21_s19, 4   ;;  %s884_s15 = smov %s619_s16 }
  0x9b   : > { %s885_s16 = smov %s751_s10  ;;  %s886_s17 = smov %s627_s18 }
  0x9c   : > { %s887_s18 = smov %s889_s30  ;;  %20 = sbr.rel (!%p18_p11) target bundleno = 9 (0x9), region = 82 }
  0xa3   :  { %319 = vsyncpa [#allocation4], 1 }
  0xa4   :  { %321 = vsyncpa [#allocation4 + $0x1], 1 }
  0xa5   :  { %322 = vsyncpa [#allocation5], 1 }
  0xa6   :  { %324 = vsyncpa [#allocation5 + $0x1], 1 }
  0xa7   :  { %325 = vsyncpa [#allocation6], 1 }
  0xa8   :  { %327 = vsyncpa [#allocation6 + $0x1], 1 }

</bundles_post_ra>
